<compile_context>
chip_gen: v7x
topology: tpu7x:2x2x1
jax: 0.10.0
libtpu: 0.0.40
codegen_flags: <defaults>
</compile_context>

<pallas_src>
import functools
import math

import jax
import jax.numpy as jnp
from jax.experimental import pallas as pl
from jax.experimental.pallas import tpu as pltpu


def _taylor_softmax_kernel(x_ref, o_ref, *, n: int):
    # x_ref block: (TB, C, HW) — TB batch elements per grid step.
    x = x_ref[...]
    # Compute dtype: f32 for f32 inputs; keep bf16 math in bf16 (v6e/v7x VPU).
    compute_dtype = jnp.float32 if x.dtype == jnp.float32 else x.dtype
    xc = x.astype(compute_dtype)

    # Horner evaluation of sum_{i=0}^{n} x^i / i!   (n=2 -> 1 + x*(1 + x/2))
    coeffs = [1.0 / math.factorial(i) for i in range(n + 1)]
    fn = jnp.full_like(xc, coeffs[n])
    for i in range(n - 1, -1, -1):
        fn = fn * xc + jnp.asarray(coeffs[i], dtype=compute_dtype)

    # Reduce over channel dim (axis=1) in f32; denominator is strictly positive
    # (each term 1 + x + x^2/2 >= 0.5), so the approx EUP reciprocal is safe.
    denom = jnp.sum(fn.astype(jnp.float32), axis=1, keepdims=True)
    inv = pl.reciprocal(denom, approx=True).astype(compute_dtype)
    o_ref[...] = (fn * inv).astype(o_ref.dtype)


def _pick_batch_tile(N: int, C: int, HW: int, itemsize: int) -> int:
    """Pick TB (batch elements per block) targeting ~2 MiB blocks.

    2 MiB per block keeps 2x double-buffered (in + out) blocks + intermediates
    well under v7x's 64 MiB VMEM and v5e's scoped limit, while being large
    enough to sit near the HBM roofline on all chips.
    """
    target_bytes = 2 * 1024 * 1024
    per_item = max(1, C * HW * itemsize)
    tb = max(1, target_bytes // per_item)
    tb = min(tb, N)
    # Keep the grid at least 2 steps when possible so both v7x TensorCores
    # (dimension_semantics="parallel") get work.
    if N >= 2:
        tb = min(tb, pl.cdiv(N, 2))
    # Prefer a divisor of N to avoid padded edge blocks.
    while tb > 1 and N % tb != 0:
        tb -= 1
    return tb


def taylor_softmax(x: jax.Array, dim: int = 1, n: int = 2) -> jax.Array:
    """Taylor softmax over `dim` for an NCHW tensor (dim must be 1 here)."""
    assert n % 2 == 0
    assert dim == 1, "kernel is specialized for channel-dim softmax (dim=1)"
    N, C, H, W = x.shape
    HW = H * W
    x2 = x.reshape(N, C, HW)

    tb = _pick_batch_tile(N, C, HW, x.dtype.itemsize)
    grid = (pl.cdiv(N, tb),)

    kernel = functools.partial(_taylor_softmax_kernel, n=n)
    out = pl.pallas_call(
        kernel,
        out_shape=jax.ShapeDtypeStruct((N, C, HW), x.dtype),
        grid_spec=pltpu.PrefetchScalarGridSpec(
            num_scalar_prefetch=0,
            grid=grid,
            in_specs=[pl.BlockSpec((tb, C, HW), lambda i: (i, 0, 0))],
            out_specs=pl.BlockSpec((tb, C, HW), lambda i: (i, 0, 0)),
        ),
        compiler_params=pltpu.CompilerParams(
            dimension_semantics=("parallel",),
            # Explicit headroom: v5e defaults to a 16 MiB scoped VMEM limit,
            # which double-buffered multi-MiB in/out blocks can overshoot.
            vmem_limit_bytes=32 * 1024 * 1024,
        ),
    )(x2)
    return out.reshape(N, C, H, W)


def taylor_softmax_ref(x, dim=1, n=2):
    # Pure-JAX reference mirroring the PyTorch forward.
    fn = jnp.ones_like(x)
    denor = 1.0
    for i in range(1, n + 1):
        denor *= i
        fn = fn + x ** i / denor
    return fn / jnp.sum(fn, axis=dim, keepdims=True)


if __name__ == "__main__":
    key = jax.random.PRNGKey(0)
    x = jax.random.normal(key, (2, 4, 16, 16), dtype=jnp.float32)

    out = taylor_softmax(x, dim=1, n=2)
    out = jax.block_until_ready(out)

    ref = taylor_softmax_ref(x, dim=1, n=2)
    assert out.shape == x.shape
    # approx reciprocal on the EUP has ~1e-3 relative error; outputs are <= 1.
    assert jnp.allclose(out, ref, atol=2e-3, rtol=2e-3)
    print("KERNEL_OK")
</pallas_src>

<mosaic_0001>
module attributes {stable_mosaic.version = 11 : i64} {
  func.func @_taylor_softmax_kernel(%arg0: i32, %arg1: memref<1x4x256xf32, #tpu.memory_space<vmem>>, %arg2: memref<1x4x256xf32, #tpu.memory_space<vmem>>) attributes {dimension_semantics = [#tpu.dimension_semantics<parallel>], iteration_bounds = array<i64: 2>, scalar_prefetch = 0 : i64, scratch_operands = 0 : i64, tpu.core_type = #tpu.core_type<tc>, window_params = [{transform_indices = @transform_0, window_bounds = array<i64: 1, 4, 256>}, {transform_indices = @transform_1, window_bounds = array<i64: 1, 4, 256>}]} {
    %c0 = arith.constant 0 : index
    %c0_0 = arith.constant 0 : index
    %c0_1 = arith.constant 0 : index
    %0 = vector.load %arg1[%c0, %c0_0, %c0_1] : memref<1x4x256xf32, #tpu.memory_space<vmem>>, vector<1x4x256xf32>
    %cst = arith.constant 5.000000e-01 : f32
    %1 = vector.broadcast %cst : f32 to vector<1x4x256xf32>
    %2 = arith.mulf %1, %0 : vector<1x4x256xf32>
    %cst_2 = arith.constant 1.000000e+00 : f32
    %3 = vector.broadcast %cst_2 : f32 to vector<1x4x256xf32>
    %4 = arith.addf %2, %3 : vector<1x4x256xf32>
    %5 = arith.mulf %4, %0 : vector<1x4x256xf32>
    %cst_3 = arith.constant 1.000000e+00 : f32
    %6 = vector.broadcast %cst_3 : f32 to vector<1x4x256xf32>
    %7 = arith.addf %5, %6 : vector<1x4x256xf32>
    %cst_4 = arith.constant dense<0.000000e+00> : vector<1x256xf32>
    %8 = vector.multi_reduction <add>, %7, %cst_4 [1] : vector<1x4x256xf32> to vector<1x256xf32>
    %9 = vector.shape_cast %8 : vector<1x256xf32> to vector<1x1x256xf32>
    %10 = tpu.reciprocal %9 {approx = true} : vector<1x1x256xf32> -> vector<1x1x256xf32>
    %11 = vector.broadcast %10 : vector<1x1x256xf32> to vector<1x4x256xf32>
    %12 = arith.mulf %7, %11 : vector<1x4x256xf32>
    %c0_5 = arith.constant 0 : index
    %c0_6 = arith.constant 0 : index
    %c0_7 = arith.constant 0 : index
    %13 = vector.load %arg2[%c0_5, %c0_6, %c0_7] : memref<1x4x256xf32, #tpu.memory_space<vmem>>, vector<1x4x256xf32>
    tpu.vector_store %arg2[%c0_5, %c0_6, %c0_7], %12 {strides = array<i32>} : memref<1x4x256xf32, #tpu.memory_space<vmem>>, vector<1x4x256xf32>,
    return
  }
  func.func @transform_0(%arg0: i32) -> (i32, i32, i32) {
    %c0_i32 = arith.constant 0 : i32
    %c0_i32_0 = arith.constant 0 : i32
    %c0_i32_1 = arith.constant 0 : i32
    return %arg0, %c0_i32, %c0_i32_0 : i32, i32, i32
  }
  func.func @transform_1(%arg0: i32) -> (i32, i32, i32) {
    %c0_i32 = arith.constant 0 : i32
    %c0_i32_0 = arith.constant 0 : i32
    %c0_i32_1 = arith.constant 0 : i32
    return %arg0, %c0_i32, %c0_i32_0 : i32, i32, i32
  }
}

</mosaic_0001>

<bundles_post_ra>
// kernel: tpu_custom_call.1
= control target key start
LH: loop header
LB: loop body
LE: loop exit
PB: predicated region body
PF: predicated region fallthrough
CT: control target
= control target key end

     0   :  { %6 = vsyncpa [#allocation3], 0  ;;  %s586_s0 = inlined_call_operand.hbm [shape: f32[2,4,256], index: 0, kind: input, shape index: {}]   ;;  %s587_s1 = inlined_call_operand.hbm [shape: f32[2,4,256], index: 1, kind: output, shape index: {}]  }
   0x1   :  { %8 = vsyncpa [#allocation3 + $0x1], 0 }
   0x2   :  { %9 = vsyncpa [#allocation4], 0 }
   0x3   :  { %11 = vsyncpa [#allocation4 + $0x1], 0  ;;  %s425_s6 = smov 0   ;;  %s427_s7 = smov 0  }
   0x4   :  { %s429_s8 = smov 0   ;;  %s431_s9 = smov 0  }
   0x5 LB: > { %s446_s10 = sadd.s32 4294967295, %s411_s9   ;;  %s249_s11 = sadd.s32 4294967294, %s411_s9   ;;  %s411_s9 = sphi %s431_s9, %s602_s9   ;;  %s407_s8 = sphi %s429_s8, %s601_s8   ;;  %s403_s7 = sphi %s427_s7, %s600_s7   ;;  %s399_s6 = sphi %s425_s6, %s599_s6  }
   0x6   : > { %s450_s12 = sadd.s32 1, %s411_s9   ;;  %s24_s13 = sadd.s32 1, %s407_s8 }
   0x7   : > { %s21_s14 = ssub.s32 %s411_s9, %s450_s12  ;;  %p31_p0 = scmp.ne.s32.totalorder %s407_s8, %s403_s7 }
   0x8   : > { %p22_p1 = scmp.eq.s32.totalorder %s21_s14, 0  ;;  %p32_p2 = scmp.eq.s32.totalorder %s411_s9, 0 }
   0x9   : > { %p37_p3 = scmp.ne.s32.totalorder %s403_s7, %s399_s6  ;;  %p38_p4 = scmp.eq.s32.totalorder %s446_s10, 0 }
   0xa   : > { %s462_s15 = scalar_select %p22_p1, %s407_s8, %s24_s13  }
   0xb   : > { %p464_p5 = por %p32_p2, %p31_p0  ;;  %p468_p6 = por %p38_p4, %p37_p3 }
   0xc   : > { %p61_p7 = scmp.eq.s32.totalorder %s446_s10, 1  ;;  %p67_p8 = scmp.eq.s32.totalorder %s249_s11, 1 }
   0xd   : > { %p277_p10 = scmp.lt.s32.totalorder %s411_s9, 2  ;;  %s87_s20 = sand.u32 1, %s407_s8  }
   0xe   : > { %p475_p11 = por %p61_p7, %p31_p0  ;;  %p479_p12 = por %p67_p8, %p37_p3 }
   0xf   : > { %s263_s21 = sshll.u32 %s411_s9, 7  ;;  %s252_s22 = sshll.u32 %s87_s20, 3 }
  0x10   : > { %s591_s18 = scalar_select %p475_p11, 1, 0 }
  0x11   : > { %s592_s19 = scalar_select %p479_p12, 1, 0 }
  0x12   : > { %s488_s25 = scalar_lea.hbm %s586_s0, %s263_s21  ;;  %s91_s26 = scalar_lea.vmem [#allocation2], %s252_s22 }
  0x13   : > { %s99_s27 = sshll.u32 %s91_s26, 4  ;;  %p492_p13 = pnand %p277_p10, %p464_p5  ;;  %s496_s27 = int_to_ptr.vmem [resolvable:$true] %s99_s27 }
  0x14   : > { %s88_s29 = scalar_lea.sflag [#allocation3], %s87_s20  ;;  %s315_s30 = scalar_lea.hbm %s488_s25, 128 }
  0x15   : > { %p316_p2 = scmp.ne.s32.totalorder %s488_s25, %s315_s30  ;;  %p317_p3 = pneg %p492_p13 }
  0x16   : > { %s320_s4 = scalar_lea.hbm %s586_s0, 256  ;;  %p321_p5 = scmp.lt.u32.totalorder %s488_s25, %s586_s0 }
  0x17   : > { %p318_p4 = pnand %p317_p3, %p316_p2  ;;  %p322_p8 = scmp.lt.u32.totalorder %s320_s4, %s315_s30 }
  0x18   : > { %p324_p9 = scmp.lt.u32.totalorder %s315_s30, %s488_s25 }
  0x19   : > { %p319_p7 = pneg %p318_p4  ;;  %p323_p10 = por %p322_p8, %p321_p5 }
  0x1b   : > { %p325_p0 = por %p324_p9, %p323_p10 }
  0x1d   : > { %p326_p1 = pnand %p325_p0, %p319_p7 }
  0x1f   : > { %329 = shalt.err (!%p326_p1)
}
  0x20   : > { %s330_s13 = scalar_lea.vmem %s496_s27, 128  ;;  %s413_s14 = smov [#allocation2]  }
  0x21   : > { %p331_p2 = scmp.ne.s32.totalorder %s496_s27, %s330_s13  ;;  %s335_s16 = sshll.u32 %s413_s14, 4  ;;  %s336_s16 = int_to_ptr.vmem [resolvable:$false] %s335_s16 }
  0x22   : > { %s337_s20 = scalar_lea.vmem %s336_s16, 256  ;;  %p338_p11 = scmp.lt.s32.totalorder %s496_s27, %s336_s16 }
  0x23   : > { %p333_p4 = pnand %p331_p2, %p317_p3  ;;  %p339_p5 = scmp.lt.s32.totalorder %s337_s20, %s330_s13 }
  0x25   : > { %p334_p12 = pneg %p333_p4  ;;  %p340_p8 = por %p339_p5, %p338_p11 }
  0x27   : > { %p341_p9 = pnand %p340_p8, %p334_p12 }
  0x29   : > { %344 = shalt.err (!%p341_p9)
}
  0x2a   : > { %272 = dma.hbm_to_vmem [thread:$0]  (!%p492_p13), %s488_s25, 128, %s496_s27, %s88_s29  }
  0x2b   : > { %p594_p0 = scmp.lt.s32.totalorder %s411_s9, 3  ;;  %p595_p1 = scmp.ge.s32.totalorder %s411_s9, 1 }
  0x2d   : > { %p105_p3 = pnand %p595_p1, %p594_p0 }
  0x2e   : > { %s530_s21 = sand.u32 (!%p105_p3), 1, %s403_s7  }
  0x2f   : > { %108 = sbr.rel (%p105_p3) target bundleno = 108 (0x6c), region = 24  ;;  %s256_s22 = sshll.u32 (!%p105_p3), %s530_s21, 3 }
  0x30   : > { %s111_s23 = scalar_lea.sflag (!%p105_p3), [#allocation3], %s530_s21  ;;  %s114_s24 = scalar_lea.vmem (!%p105_p3), [#allocation2], %s256_s22 }
  0x36   : > { %390 = dma.done.wait (%p468_p6), %s111_s23, 128  }
  0x37   : > { %392 = vsyncadd (%p468_p6), %s111_s23, 4294967168  ;;  %v133_v0 = vld [vmem:[%s114_s24] sm:$0xff]  ;;  %vm141_vm0 = vcmask 1043456   ;;  %s132_s17 = scalar_lea.vmem [#allocation5], %s256_s22  ;;  %s264_s26 = sshll.u32 %s446_s10, 7 }
  0x38   : > { %v134_v1 = vmul.f32 0.5, %v133_v0  ;;  %s179_s25 = sshll.u32 %s132_s17, 4  ;;  %s544_s29 = scalar_lea.hbm %s587_s1, %s264_s26  ;;  %s539_s25 = int_to_ptr.vmem [resolvable:$true] %s179_s25 }
  0x39   : > { %s165_s30 = scalar_lea.sflag [#allocation4], %s530_s21  ;;  %s345_s2 = scalar_lea.vmem %s539_s25, 128 }
  0x3a   : > { %v135_v2 = vadd.f32 1.0, %v134_v1  ;;  %p346_p6 = scmp.ne.s32.totalorder %s539_s25, %s345_s2  ;;  %p596_p11 = scmp.ne.s32.totalorder %s591_s18, 0 }
  0x3b   : > { %s414_s10 = smov [#allocation5]  }
  0x3c   : > { %v136_v3 = vmul.f32 %v135_v2, %v133_v0  ;;  %p347_p12 = pnand %p346_p6, %p596_p11  ;;  %s349_s3 = sshll.u32 %s414_s10, 4  ;;  %s350_s3 = int_to_ptr.vmem [resolvable:$false] %s349_s3 }
  0x3d   : > { %s351_s4 = scalar_lea.vmem %s350_s3, 256  ;;  %p352_p7 = scmp.lt.s32.totalorder %s539_s25, %s350_s3 }
  0x3e   : > { %v137_v4 = vadd.f32 1.0, %v136_v3  ;;  %p348_p13 = pneg %p347_p12  ;;  %p353_p10 = scmp.lt.s32.totalorder %s351_s4, %s345_s2 }
  0x40   : > { %v139_v5 = vcombine.high %v137_v4, %v137_v4  ;;  %v142_v6 = vsel %vm141_vm0, %v137_v4, 0.0  ;;  %p354_p2 = por %p353_p10, %p352_p7 }
  0x41   : > { %v143_v7 = vrot.slane %v142_v6, 4 }
  0x42   : > { %v149_v8 = vsel %vm141_vm0, %v139_v5, 0.0  ;;  %p355_p4 = pnand %p354_p2, %p348_p13 }
  0x43   : > { %v144_v9 = vadd.f32 %v143_v7, %v142_v6  ;;  %v150_v10 = vrot.slane %v149_v8, 4 }
  0x45   : > { %v145_v11 = vrot.slane %v144_v9, 2  ;;  %v151_v12 = vadd.f32 %v150_v10, %v149_v8 }
  0x47   : > { %v146_v13 = vadd.f32 %v145_v11, %v144_v9  ;;  %v152_v14 = vrot.slane %v151_v12, 2 }
  0x49   : > { %v147_v15 = vrot.slane %v146_v13, 1  ;;  %v153_v16 = vadd.f32 %v152_v14, %v151_v12 }
  0x4b   : > { %v148_v17 = vadd.f32 %v147_v15, %v146_v13  ;;  %v154_v18 = vrot.slane %v153_v16, 1 }
  0x4d   : > { %v155_v19 = vadd.f32 %v154_v18, %v153_v16  ;;  %311 = vrcp.f32 %v148_v17 }
  0x4f   : > { %313 = vrcp.f32 %v155_v19 }
  0x57   : > { %v312_v20 = vpop.eup %311 }
  0x59   : > { %v314_v21 = vpop.eup %313 }
  0x5a   : > { %v160_v22 = vcombine.low %v312_v20, %v314_v21 }
  0x5c   : > { %v162_v23 = vmul.f32 %v160_v22, %v137_v4 }
  0x5e   : > { %163 = vst [vmem:[%s132_s17] sm:$0xff] %v162_v23 }
  0x5f   : > { %358 = shalt.err (!%p355_p4)
}
  0x60   : > { %s359_s5 = scalar_lea.hbm %s544_s29, 128  ;;  %s363_s14 = scalar_lea.hbm %s587_s1, 256 }
  0x61   : > { %p360_p5 = scmp.ne.s32.totalorder %s544_s29, %s359_s5  ;;  %p364_p0 = scmp.lt.u32.totalorder %s544_s29, %s587_s1 }
  0x62   : > { %p365_p1 = scmp.lt.u32.totalorder %s363_s14, %s359_s5  ;;  %p367_p6 = scmp.lt.u32.totalorder %s359_s5, %s544_s29 }
  0x63   : > { %p361_p8 = pnand %p360_p5, %p596_p11 }
  0x64   : > { %p366_p3 = por %p365_p1, %p364_p0 }
  0x65   : > { %p362_p9 = pneg %p361_p8 }
  0x66   : > { %p368_p12 = por %p367_p6, %p366_p3 }
  0x68   : > { %p369_p13 = pnand %p368_p12, %p362_p9 }
  0x6a   : > { %372 = shalt.err (!%p369_p13)
}
  0x6b   : > { %267 = dma.vmem_to_hbm [thread:$0]  (%p596_p11), %s539_s25, 128, %s544_s29, %s165_s30  }
  0x6c PF: > { %s191_s21 = sand.u32 1, %s399_s6   ;;  %p597_p7 = scmp.ne.s32.totalorder %s592_s19, 0 }
  0x6d   : > { %p598_p10 = scmp.ge.s32.totalorder %s411_s9, 2  ;;  %s192_s22 = scalar_lea.sflag [#allocation4], %s191_s21 }
  0x6f   : > { %p274_p2 = pnand %p598_p10, %p597_p7 }
  0x71   : > { %394 = dma.done.wait (!%p274_p2), %s192_s22, 128  }
  0x72   : > { %396 = vsyncadd (!%p274_p2), %s192_s22, 4294967168  ;;  %p14_p4 = scmp.ge.s32.totalorder %s450_s12, 4   ;;  %s599_s6 = smov %s403_s7 }
  0x73   : > { %s600_s7 = smov %s407_s8  ;;  %s601_s8 = smov %s462_s15 }
  0x74   : > { %s602_s9 = smov %s450_s12  ;;  %16 = sbr.rel (!%p14_p4) target bundleno = 5 (0x5), region = 69 }
  0x7b   :  { %197 = vsyncpa [#allocation3], 1 }
  0x7c   :  { %199 = vsyncpa [#allocation3 + $0x1], 1 }
  0x7d   :  { %200 = vsyncpa [#allocation4], 1 }
  0x7e   :  { %202 = vsyncpa [#allocation4 + $0x1], 1 }

</bundles_post_ra>
